<compile_context>
chip_gen: v7x
topology: tpu7x:2x2x1
jax: 0.10.0
libtpu: 0.0.40
codegen_flags: <defaults>
</compile_context>

<pallas_src>
import jax
import jax.numpy as jnp
from jax.experimental import pallas as pl
from jax.experimental.pallas import tpu as pltpu


def _frozen_bn_kernel(x_ref, scale_ref, shift_ref, o_ref):
    # (tm, tn) spatial tile, (tm, 1) per-row scale/shift (f32). One FMA/elem.
    x = x_ref[...].astype(jnp.float32)
    o_ref[...] = (x * scale_ref[...] + shift_ref[...]).astype(o_ref.dtype)


def frozen_batch_norm_2d(x, weight, bias, running_mean, running_var,
                         *, eps=1e-5,
                         max_tile_bytes=2 * 1024 * 1024,
                         max_tile_cols=8192):
    """x: (N, C, H, W); weight/bias/running_mean/running_var: (C,)."""
    N, C, H, W = x.shape
    NC, HW = N * C, H * W

    # ---- wrapper-side precompute: C-element scale/shift in f32 ------------
    w32, b32, rm32, rv32 = (jnp.asarray(a, jnp.float32)
                            for a in (weight, bias, running_mean, running_var))
    scale_c = w32 * jax.lax.rsqrt(rv32 + eps)
    shift_c = b32 - rm32 * scale_c

    # Per-row params (tiny: NC * 4 bytes each); row n*C + c -> channel c.
    scale = jnp.tile(scale_c, N).reshape(NC, 1)
    shift = jnp.tile(shift_c, N).reshape(NC, 1)

    x2 = x.reshape(NC, HW)

    # ---- tile selection ----------------------------------------------------
    # Last dim: full spatial extent when reasonable (lane-dense and always a
    # legal block dim); otherwise a big multiple of 128 with a cdiv grid.
    if HW <= max_tile_cols:
        tn = HW
    else:
        tn = 4096

    # Rows: fill ~max_tile_bytes per tile (f32-equivalent budget); must be a
    # multiple of 8 unless we take the whole row axis.
    budget_rows = max(1, (max_tile_bytes // 4) // tn)
    if budget_rows >= NC:
        tm = NC
    else:
        tm = max(8, (budget_rows // 8) * 8)

    grid = (pl.cdiv(NC, tm), pl.cdiv(HW, tn))

    x_spec = pl.BlockSpec((tm, tn), lambda i, j: (i, j))
    p_spec = pl.BlockSpec((tm, 1), lambda i, j: (i, 0))
    o_spec = pl.BlockSpec((tm, tn), lambda i, j: (i, j))

    # VMEM budget: double-buffered (in + out) tiles + tiny params + slack,
    # clamped to a range that is safe on v5e/v6e/v7x.
    x_bytes = jnp.dtype(x.dtype).itemsize
    tile_bytes = tm * tn * x_bytes
    vmem_limit = 2 * (2 * tile_bytes + 2 * tm * 4) + (2 << 20)
    vmem_limit = int(min(max(vmem_limit, 16 << 20), 48 << 20))

    out2 = pl.pallas_call(
        _frozen_bn_kernel,
        out_shape=jax.ShapeDtypeStruct((NC, HW), x.dtype),
        grid_spec=pltpu.PrefetchScalarGridSpec(
            num_scalar_prefetch=0,
            grid=grid,
            in_specs=[x_spec, p_spec, p_spec],
            out_specs=o_spec,
        ),
        compiler_params=pltpu.CompilerParams(
            dimension_semantics=("parallel", "parallel"),
            vmem_limit_bytes=vmem_limit),
    )(x2, scale, shift)

    return out2.reshape(N, C, H, W)


def _reference(x, weight, bias, running_mean, running_var, eps=1e-5):
    scale = (weight * jax.lax.rsqrt(running_var + eps)).reshape(1, -1, 1, 1)
    shift = bias.reshape(1, -1, 1, 1) - running_mean.reshape(1, -1, 1, 1) * scale
    return x * scale + shift


if __name__ == "__main__":
    key = jax.random.PRNGKey(0)

    # Primary small test shape.
    N, C, H, W = 2, 4, 16, 16
    kx, kw, kb, km, kv = jax.random.split(key, 5)
    x = jax.random.normal(kx, (N, C, H, W), dtype=jnp.float32)

    # Deterministic "frozen" buffers (perturbed from module defaults so the
    # affine transform is non-trivial).
    weight = jnp.ones((C,), jnp.float32) + 0.1 * jax.random.normal(kw, (C,))
    bias = jnp.zeros((C,), jnp.float32) + 0.1 * jax.random.normal(kb, (C,))
    running_mean = 0.5 * jax.random.normal(km, (C,))
    running_var = jnp.ones((C,), jnp.float32) + 0.1 * jnp.abs(
        jax.random.normal(kv, (C,)))

    out = frozen_batch_norm_2d(x, weight, bias, running_mean, running_var)
    out = jax.block_until_ready(out)
    ref = _reference(x, weight, bias, running_mean, running_var)
    assert out.shape == x.shape and out.dtype == x.dtype
    assert jnp.allclose(out, ref, atol=1e-5, rtol=1e-5)

    # Secondary check: non-128-aligned spatial dims (full-extent last-dim block).
    N2, C2, H2, W2 = 2, 3, 7, 9
    k2 = jax.random.split(key, 2)[1]
    x2 = jax.random.normal(k2, (N2, C2, H2, W2), dtype=jnp.float32)
    w2 = jnp.linspace(0.5, 1.5, C2, dtype=jnp.float32)
    b2 = jnp.linspace(-0.2, 0.2, C2, dtype=jnp.float32)
    rm2 = jnp.linspace(-0.1, 0.3, C2, dtype=jnp.float32)
    rv2 = jnp.linspace(0.8, 1.2, C2, dtype=jnp.float32)
    out2 = jax.block_until_ready(frozen_batch_norm_2d(x2, w2, b2, rm2, rv2))
    ref2 = _reference(x2, w2, b2, rm2, rv2)
    assert jnp.allclose(out2, ref2, atol=1e-5, rtol=1e-5)

    print("KERNEL_OK")
</pallas_src>

<mosaic_0001>
module attributes {stable_mosaic.version = 11 : i64} {
  func.func @_frozen_bn_kernel(%arg0: i32, %arg1: i32, %arg2: memref<8x256xf32, #tpu.memory_space<vmem>>, %arg3: memref<8x1xf32, #tpu.memory_space<vmem>>, %arg4: memref<8x1xf32, #tpu.memory_space<vmem>>, %arg5: memref<8x256xf32, #tpu.memory_space<vmem>>) attributes {dimension_semantics = [#tpu.dimension_semantics<parallel>, #tpu.dimension_semantics<parallel>], iteration_bounds = array<i64: 1, 1>, scalar_prefetch = 0 : i64, scratch_operands = 0 : i64, tpu.core_type = #tpu.core_type<tc>, window_params = [{transform_indices = @transform_0, window_bounds = array<i64: 8, 256>}, {transform_indices = @transform_1, window_bounds = array<i64: 8, 1>}, {transform_indices = @transform_2, window_bounds = array<i64: 8, 1>}, {transform_indices = @transform_3, window_bounds = array<i64: 8, 256>}]} {
    %c0 = arith.constant 0 : index
    %c0_0 = arith.constant 0 : index
    %0 = vector.load %arg2[%c0, %c0_0] : memref<8x256xf32, #tpu.memory_space<vmem>>, vector<8x256xf32>
    %c0_1 = arith.constant 0 : index
    %c0_2 = arith.constant 0 : index
    %1 = vector.load %arg3[%c0_1, %c0_2] : memref<8x1xf32, #tpu.memory_space<vmem>>, vector<8x1xf32>
    %2 = vector.broadcast %1 : vector<8x1xf32> to vector<8x256xf32>
    %3 = arith.mulf %0, %2 : vector<8x256xf32>
    %c0_3 = arith.constant 0 : index
    %c0_4 = arith.constant 0 : index
    %4 = vector.load %arg4[%c0_3, %c0_4] : memref<8x1xf32, #tpu.memory_space<vmem>>, vector<8x1xf32>
    %5 = vector.broadcast %4 : vector<8x1xf32> to vector<8x256xf32>
    %6 = arith.addf %3, %5 : vector<8x256xf32>
    %c0_5 = arith.constant 0 : index
    %c0_6 = arith.constant 0 : index
    %7 = vector.load %arg5[%c0_5, %c0_6] : memref<8x256xf32, #tpu.memory_space<vmem>>, vector<8x256xf32>
    tpu.vector_store %arg5[%c0_5, %c0_6], %6 {strides = array<i32>} : memref<8x256xf32, #tpu.memory_space<vmem>>, vector<8x256xf32>,
    return
  }
  func.func @transform_0(%arg0: i32, %arg1: i32) -> (i32, i32) {
    %c0_i32 = arith.constant 0 : i32
    return %arg0, %arg1 : i32, i32
  }
  func.func @transform_1(%arg0: i32, %arg1: i32) -> (i32, i32) {
    %c0_i32 = arith.constant 0 : i32
    %c0_i32_0 = arith.constant 0 : i32
    return %arg0, %c0_i32 : i32, i32
  }
  func.func @transform_2(%arg0: i32, %arg1: i32) -> (i32, i32) {
    %c0_i32 = arith.constant 0 : i32
    %c0_i32_0 = arith.constant 0 : i32
    return %arg0, %c0_i32 : i32, i32
  }
  func.func @transform_3(%arg0: i32, %arg1: i32) -> (i32, i32) {
    %c0_i32 = arith.constant 0 : i32
    return %arg0, %arg1 : i32, i32
  }
}

</mosaic_0001>

<bundles_post_ra>
// kernel: tpu_custom_call.1
= control target key start
LH: loop header
LB: loop body
LE: loop exit
PB: predicated region body
PF: predicated region fallthrough
CT: control target
= control target key end

     0   :  { %s122_s0 = inlined_call_operand.vmem [shape: f32[8,256], index: 0, kind: input, shape index: {}]   ;;  %s123_s1 = inlined_call_operand.vmem [shape: f32[8,1], index: 1, kind: input, shape index: {}]   ;;  %s124_s2 = inlined_call_operand.vmem [shape: f32[8,1], index: 2, kind: input, shape index: {}]   ;;  %s125_s3 = inlined_call_operand.hbm [shape: f32[8,256], index: 3, kind: output, shape index: {}]  }
   0x1   :  { %v17_v0 = vld [vmem:[%s123_s1] sm:$0xff] }
   0x2   :  { %8 = vsyncpa [#allocation3], 0  ;;  %v76_v1 = vmov 0   ;;  %v25_v2 = vld [vmem:[%s124_s2] sm:$0xff]  ;;  %v16_v5 = vld [vmem:[%s122_s0 + $0x8] sm:$0xff]  ;;  %s77_s20 = smov [#allocation2]  }
   0x3   :  { %51 = vset.pattern.permute.xlu0 %v76_v1  ;;  %v15_v4 = vld [vmem:[%s122_s0] sm:$0xff]  ;;  %s41_s1 = sshll.u32 %s77_s20, 4  ;;  %s42_s1 = int_to_ptr.vmem [resolvable:$true] %s41_s1 }
   0x4   :  { %20 = vperm.xlu0 %51, %v17_v0   ;;  %s52_s2 = scalar_lea.vmem %s42_s1, 256  ;;  %p57_p1 = scmp.lt.s32.totalorder %s42_s1, %s42_s1 }
   0x5   :  { %p53_p0 = scmp.ne.s32.totalorder %s42_s1, %s52_s2  ;;  %p58_p2 = scmp.lt.s32.totalorder %s52_s2, %s52_s2 }
   0x7   :  { %p59_p3 = por %p58_p2, %p57_p1 }
   0x8   :  { %28 = vperm.xlu0 %51, %v25_v2  }
   0x9   :  { %p60_p4 = pnand %p59_p3, %p53_p0 }
  0x83   :  { %v21_v3 = vpop.permute.xlu0 %20 }
  0x84   :  { %v23_v6 = vmul.f32 %v21_v3, %v15_v4  ;;  %v24_v7 = vmul.f32 %v21_v3, %v16_v5 }
  0x87   :  { %v29_v8 = vpop.permute.xlu0 %28 }
  0x88   :  { %v31_v9 = vadd.f32 %v29_v8, %v23_v6  ;;  %v32_v10 = vadd.f32 %v29_v8, %v24_v7 }
  0x8a   :  { %33 = vst [vmem:[#allocation2] sm:$0xff] %v31_v9  ;;  %34 = vst [vmem:[#allocation2 + $0x8] sm:$0xff] %v32_v10 }
  0x8b   :  { %63 = shalt.err (!%p60_p4)
}
  0x8c   :  { %s64_s0 = scalar_lea.hbm %s125_s3, 256 }
  0x8d   :  { %p65_p5 = scmp.ne.s32.totalorder %s125_s3, %s64_s0  ;;  %p68_p6 = scmp.lt.u32.totalorder %s64_s0, %s125_s3 }
  0x8f   :  { %p70_p7 = pnand %p68_p6, %p65_p5 }
  0x91   :  { %73 = shalt.err (!%p70_p7)
}
  0x92   :  { %44 = dma.vmem_to_hbm [thread:$0]  %s42_s1, 256, %s125_s3, [#allocation3]  }
  0x93   :  { %74 = dma.done.wait [#allocation3], 256  }
  0x94   :  { %75 = vsyncadd [#allocation3], 4294967040 }
  0x95   :  { %48 = vsyncpa [#allocation3], 1 }

</bundles_post_ra>
